<compile_context>
chip_gen: v5e
topology: v5e:2x2
jax: 0.10.0
libtpu: 0.0.40
codegen_flags: <defaults>
</compile_context>

<pallas_src>
import jax
import jax.numpy as jnp
from jax import lax
from jax.experimental import pallas as pl
from jax.experimental.pallas import tpu as pltpu


# ------------------------------------------------------------------ helpers

def _round_up(x, m):
    return (x + m - 1) // m * m


def _pick_tk(K, tm, D, Bt_pad, Wd, *, tk_max=2048, vmem_budget=24 * 1024 * 1024):
    """Largest K tile (<= tk_max) whose working set fits the VMEM budget."""
    def vmem_bytes(tk):
        stream = 2 * 2 * (tm * tk + tk * D)                 # bf16, double-buffered
        resident = (2 * (Bt_pad * Wd + Wd * D + Bt_pad * D)  # txt, w_txt, s_n (bf16)
                    + 4 * (2 * D + tm * D + 2 * tm * Bt_pad))  # biases, acc, out
        return stream + resident

    tk = min(_round_up(K, 256), tk_max)
    while tk > 256 and vmem_bytes(tk) > vmem_budget:
        tk //= 2
    return tk


# ------------------------------------------------------------------ kernel

def _fused_amfmn_kernel(x_ref, w_img_ref, b_img_ref,
                        txt_ref, w_txt_ref, b_txt_ref,
                        out_ref, acc_ref, sn_ref):
    """Fused image-linear (K-tiled) + text-linear + cosine_sim.

    x_ref:     (tm, tk)      bf16   image features, (m, k) tile
    w_img_ref: (tk, D)       bf16   image projection weight, K-tile k
    b_img_ref: (1, D)        f32
    txt_ref:   (Bt_pad, Wd)  bf16   pooled text features (resident)
    w_txt_ref: (Wd, D)       bf16
    b_txt_ref: (1, D)        f32
    out_ref:   (tm, Bt_pad)  f32    cosine similarities for this batch tile
    acc_ref:   (tm, D)       f32    accumulator scratch (persists over K axis)
    sn_ref:    (Bt_pad, D)   bf16   normalized text features (computed at k==0)
    """
    k = pl.program_id(1)
    eps = 1e-8

    @pl.when(k == 0)
    def _():
        acc_ref[...] = jnp.zeros_like(acc_ref)
        # Hoisted text path: projection + l2norm + bf16 cast, done at step 0
        # (per batch tile, so it stays correct under megacore sharding of the
        # parallel m axis) and hidden under the K loop's image-tile DMAs.
        txt_feat = jnp.dot(txt_ref[...], w_txt_ref[...],
                           preferred_element_type=jnp.float32) + b_txt_ref[...]
        inv_t = pl.reciprocal(
            jnp.sqrt(jnp.sum(txt_feat * txt_feat, axis=-1, keepdims=True)) + eps,
            approx=True)
        sn_ref[...] = (txt_feat * inv_t).astype(sn_ref.dtype)

    # bf16 MXU operands, f32 accumulation.
    acc_ref[...] += jnp.dot(x_ref[...], w_img_ref[...],
                            preferred_element_type=jnp.float32)

    @pl.when(k == pl.num_programs(1) - 1)
    def _():
        # Bias added once, at finalize (f32 VPU math).
        img_feat = acc_ref[...] + b_img_ref[...]                       # (tm, D)
        # l2norm: norm = sqrt(sum(x^2, -1)) + eps ; x = x / norm (PyTorch l2norm).
        # Full feature dim D is visible here (D is never tiled) -> norms correct.
        inv_i = pl.reciprocal(
            jnp.sqrt(jnp.sum(img_feat * img_feat, axis=-1, keepdims=True)) + eps,
            approx=True)
        im_n = (img_feat * inv_i).astype(jnp.bfloat16)                 # native MXU rate
        # Contract last dims of both operands -> no XLU transpose of s_n.
        sims = lax.dot_general(im_n, sn_ref[...], (((1,), (1,)), ((), ())),
                               preferred_element_type=jnp.float32)
        out_ref[...] = sims.astype(out_ref.dtype)


# ------------------------------------------------------------------ wrapper

def fused_amfmn_forward(flat_img, w_img, b_img, pooled_txt, w_txt, b_txt):
    """Fused forward: sims = cosine_sim(flat_img @ w_img + b_img,
                                        pooled_txt @ w_txt + b_txt)."""
    B, K = flat_img.shape
    Kw, D = w_img.shape
    assert K == Kw
    Bt, Wd = pooled_txt.shape
    assert w_txt.shape == (Wd, D)
    assert b_img.shape[-1] == D and b_txt.shape[-1] == D

    # ---- padding / tiling choices -------------------------------------
    # Image batch: multiple of 16 (bf16 packs 16 rows per vreg); tile M at
    # <=128 rows so the "parallel" m axis can shard across v7x TensorCores
    # and the acc scratch stays small.
    B_pad = _round_up(max(B, 16), 16)
    if B_pad > 128:
        tm = 128
        B_pad = _round_up(B_pad, tm)
    else:
        tm = B_pad
    n_m = B_pad // tm

    # Text batch: multiple of 128 so the sims output is lane-dense.
    Bt_pad = _round_up(max(Bt, 128), 128)

    # Adaptive K tile sized against a 24 MiB VMEM budget (v7x-safe).
    tk = _pick_tk(K, tm, D, Bt_pad, Wd)
    K_pad = _round_up(K, tk)
    n_k = K_pad // tk

    # ---- operand prep (bf16 MXU operands only; biases stay f32) --------
    x = jnp.pad(flat_img, ((0, B_pad - B), (0, K_pad - K))).astype(jnp.bfloat16)
    wi = jnp.pad(w_img, ((0, K_pad - K), (0, 0))).astype(jnp.bfloat16)
    t = jnp.pad(pooled_txt, ((0, Bt_pad - Bt), (0, 0))).astype(jnp.bfloat16)
    wt = w_txt.astype(jnp.bfloat16)
    bi = b_img.reshape(1, D).astype(jnp.float32)
    bt = b_txt.reshape(1, D).astype(jnp.float32)

    flops = (2 * B_pad * K_pad * D               # image projection
             + n_m * 2 * Bt_pad * Wd * D         # text projection (per m tile)
             + 2 * B_pad * Bt_pad * D)           # cosine-sim matmul
    bytes_accessed = (x.size * 2 + n_m * wi.size * 2 + t.size * 2 + wt.size * 2
                      + bi.size * 4 + bt.size * 4 + B_pad * Bt_pad * 4)

    sims_pad = pl.pallas_call(
        _fused_amfmn_kernel,
        out_shape=jax.ShapeDtypeStruct((B_pad, Bt_pad), jnp.float32),
        grid_spec=pltpu.PrefetchScalarGridSpec(
            num_scalar_prefetch=0,
            grid=(n_m, n_k),
            in_specs=[
                pl.BlockSpec((tm, tk), lambda m, k: (m, k)),     # image (m, k) tile
                pl.BlockSpec((tk, D), lambda m, k: (k, 0)),      # weight K-tile
                pl.BlockSpec((1, D), lambda m, k: (0, 0)),       # b_img (resident)
                pl.BlockSpec((Bt_pad, Wd), lambda m, k: (0, 0)),  # pooled text
                pl.BlockSpec((Wd, D), lambda m, k: (0, 0)),      # w_txt
                pl.BlockSpec((1, D), lambda m, k: (0, 0)),       # b_txt
            ],
            out_specs=pl.BlockSpec((tm, Bt_pad), lambda m, k: (m, 0)),
            scratch_shapes=[
                pltpu.VMEM((tm, D), jnp.float32),       # image-projection accumulator
                pltpu.VMEM((Bt_pad, D), jnp.bfloat16),  # normalized text features
            ],
        ),
        compiler_params=pltpu.CompilerParams(
            dimension_semantics=("parallel", "arbitrary"),  # m parallel, K reduction
            vmem_limit_bytes=32 * 1024 * 1024,
        ),
        cost_estimate=pl.CostEstimate(
            flops=flops,
            transcendentals=2 * (B_pad + n_m * Bt_pad),
            bytes_accessed=bytes_accessed,
        ),
    )(x, wi, bi, t, wt, bt)

    return sims_pad[:B, :Bt]


# ------------------------------------------------------------------ model

def init_params(key, img_shape, vocab_size=32, word_dim=64, embed_dim=128):
    """Deterministic synthetic parameters (no checkpoint loading)."""
    C, H, W = img_shape
    k1, k2, k3, k4, k5 = jax.random.split(key, 5)
    flat = C * H * W
    scale_img = 1.0 / jnp.sqrt(jnp.float32(flat))
    scale_txt = 1.0 / jnp.sqrt(jnp.float32(word_dim))
    return {
        "w_img": jax.random.normal(k1, (flat, embed_dim), jnp.float32) * scale_img,
        "b_img": jax.random.normal(k2, (embed_dim,), jnp.float32) * 0.01,
        "embed": jax.random.normal(k3, (vocab_size, word_dim), jnp.float32) * 0.1,
        "w_txt": jax.random.normal(k4, (word_dim, embed_dim), jnp.float32) * scale_txt,
        "b_txt": jax.random.normal(k5, (embed_dim,), jnp.float32) * 0.01,
    }


def base_model_forward(params, img, text):
    """img: (B, C, H, W) f32 NCHW, text: (Bt, L) int32 token ids -> sims (B, Bt)."""
    B = img.shape[0]

    # ExtractFeature + VSA_Module stub: flatten NCHW image; the projection to
    # the joint embedding space runs K-tiled inside the fused Pallas kernel.
    flat_img = img.reshape(B, -1)
    # self.drop_g_v is defined but not applied in the reference forward; skipped.

    # Skipthoughts_Embedding_Module stub: embedding lookup + mean pooling
    # (glue in plain JAX); the linear projection runs inside the fused kernel.
    tok_emb = params["embed"][text]              # (Bt, L, word_dim)
    pooled = jnp.mean(tok_emb, axis=1)           # (Bt, word_dim)

    # Fused: image linear + text linear + cosine_sim, one pallas_call.
    sims = fused_amfmn_forward(flat_img, params["w_img"], params["b_img"],
                               pooled, params["w_txt"], params["b_txt"])
    return sims


# ------------------------------------------------------------------ main

if __name__ == "__main__":
    key = jax.random.PRNGKey(0)
    k_img, k_txt, k_par = jax.random.split(key, 3)

    B, C, H, W = 2, 4, 16, 16          # small NCHW image batch (flat = 1024)
    Bt, L = 2, 8                       # small text batch, sequence length
    vocab_size, word_dim, embed_dim = 32, 64, 128

    img = jax.random.normal(k_img, (B, C, H, W), jnp.float32)
    text = jax.random.randint(k_txt, (Bt, L), 0, vocab_size, jnp.int32)
    params = init_params(k_par, (C, H, W), vocab_size=vocab_size,
                         word_dim=word_dim, embed_dim=embed_dim)

    sims = base_model_forward(params, img, text)
    sims = jax.block_until_ready(sims)

    # --- sanity check against a pure-JAX reference that mimics the bf16 MXU
    #     operand casts on the projections (f32 accumulation); tolerance
    #     loosened for the in-kernel bf16 cosine-sim matmul + approx EUP
    #     reciprocal in the normalization (documented precision trade).
    def _bf(x):
        return x.astype(jnp.bfloat16).astype(jnp.float32)

    def _ref_cos(im, s, eps=1e-8):
        imn = im / (jnp.sqrt(jnp.sum(im * im, -1, keepdims=True)) + eps)
        sn = s / (jnp.sqrt(jnp.sum(s * s, -1, keepdims=True)) + eps)
        return imn @ sn.T

    flat_img = img.reshape(B, -1)
    pooled = jnp.mean(params["embed"][text], axis=1)
    gf = _bf(flat_img) @ _bf(params["w_img"]) + params["b_img"]
    tf = _bf(pooled) @ _bf(params["w_txt"]) + params["b_txt"]
    ref = _ref_cos(gf, tf)

    assert sims.shape == (B, Bt)
    assert jnp.max(jnp.abs(sims - ref)) < 2e-2, jnp.max(jnp.abs(sims - ref))

    print("KERNEL_OK")
</pallas_src>

<mosaic_0001>
module attributes {stable_mosaic.version = 11 : i64} {
  func.func @_fused_amfmn_kernel(%arg0: i32, %arg1: i32, %arg2: memref<16x1024xbf16, #tpu.memory_space<vmem>>, %arg3: memref<1024x128xbf16, #tpu.memory_space<vmem>>, %arg4: memref<1x128xf32, #tpu.memory_space<vmem>>, %arg5: memref<128x64xbf16, #tpu.memory_space<vmem>>, %arg6: memref<64x128xbf16, #tpu.memory_space<vmem>>, %arg7: memref<1x128xf32, #tpu.memory_space<vmem>>, %arg8: memref<16x128xf32, #tpu.memory_space<vmem>>, %arg9: memref<16x128xf32, #tpu.memory_space<vmem>>, %arg10: memref<128x128xbf16, #tpu.memory_space<vmem>>) attributes {dimension_semantics = [#tpu.dimension_semantics<parallel>, #tpu.dimension_semantics<arbitrary>], iteration_bounds = array<i64: 1, 1>, scalar_prefetch = 0 : i64, scratch_operands = 2 : i64, tpu.core_type = #tpu.core_type<tc>, window_params = [{transform_indices = @transform_0, window_bounds = array<i64: 16, 1024>}, {transform_indices = @transform_1, window_bounds = array<i64: 1024, 128>}, {pipeline_mode = #tpu.pipeline_mode<synchronous>, transform_indices = @transform_2, window_bounds = array<i64: 1, 128>}, {pipeline_mode = #tpu.pipeline_mode<synchronous>, transform_indices = @transform_3, window_bounds = array<i64: 128, 64>}, {pipeline_mode = #tpu.pipeline_mode<synchronous>, transform_indices = @transform_4, window_bounds = array<i64: 64, 128>}, {pipeline_mode = #tpu.pipeline_mode<synchronous>, transform_indices = @transform_5, window_bounds = array<i64: 1, 128>}, {transform_indices = @transform_6, window_bounds = array<i64: 16, 128>}]} {
    %c0_i32 = arith.constant 0 : i32
    %0 = arith.cmpi eq, %arg1, %c0_i32 : i32
    %1 = arith.extui %0 : i1 to i32
    %c0_i32_0 = arith.constant 0 : i32
    %2 = arith.cmpi ne, %1, %c0_i32_0 : i32
    scf.if %2 {
      %cst_10 = arith.constant 0.000000e+00 : f32
      %12 = vector.broadcast %cst_10 : f32 to vector<16x128xf32>
      %c0_11 = arith.constant 0 : index
      %c0_12 = arith.constant 0 : index
      %13 = vector.load %arg9[%c0_11, %c0_12] : memref<16x128xf32, #tpu.memory_space<vmem>>, vector<16x128xf32>
      tpu.vector_store %arg9[%c0_11, %c0_12], %12 {strides = array<i32>} : memref<16x128xf32, #tpu.memory_space<vmem>>, vector<16x128xf32>,
      %c0_13 = arith.constant 0 : index
      %c0_14 = arith.constant 0 : index
      %14 = vector.load %arg5[%c0_13, %c0_14] : memref<128x64xbf16, #tpu.memory_space<vmem>>, vector<128x64xbf16>
      %c0_15 = arith.constant 0 : index
      %c0_16 = arith.constant 0 : index
      %15 = vector.load %arg6[%c0_15, %c0_16] : memref<64x128xbf16, #tpu.memory_space<vmem>>, vector<64x128xbf16>
      %cst_17 = arith.constant dense<0.000000e+00> : vector<128x128xf32>
      %16 = tpu.matmul %14, %15, %cst_17 {dimension_numbers = #tpu.dot_dimension_numbers<[1], [0], [0], [1], [0, 0, 1, 1], [], []>} : vector<128x64xbf16>, vector<64x128xbf16>, vector<128x128xf32> -> vector<128x128xf32>
      %c0_18 = arith.constant 0 : index
      %c0_19 = arith.constant 0 : index
      %17 = vector.load %arg7[%c0_18, %c0_19] : memref<1x128xf32, #tpu.memory_space<vmem>>, vector<1x128xf32>
      %18 = vector.broadcast %17 : vector<1x128xf32> to vector<128x128xf32>
      %19 = arith.addf %16, %18 : vector<128x128xf32>
      %20 = arith.mulf %19, %19 : vector<128x128xf32>
      %cst_20 = arith.constant dense<0.000000e+00> : vector<128xf32>
      %21 = vector.multi_reduction <add>, %20, %cst_20 [1] : vector<128x128xf32> to vector<128xf32>
      %22 = vector.shape_cast %21 : vector<128xf32> to vector<128x1xf32>
      %23 = math.sqrt %22 : vector<128x1xf32>
      %cst_21 = arith.constant 9.99999993E-9 : f32
      %24 = vector.broadcast %cst_21 : f32 to vector<128x1xf32>
      %25 = arith.addf %23, %24 : vector<128x1xf32>
      %26 = tpu.reciprocal %25 {approx = true} : vector<128x1xf32> -> vector<128x1xf32>
      %27 = vector.broadcast %26 : vector<128x1xf32> to vector<128x128xf32>
      %28 = arith.mulf %19, %27 : vector<128x128xf32>
      %29 = arith.truncf %28 : vector<128x128xf32> to vector<128x128xbf16>
      %c0_22 = arith.constant 0 : index
      %c0_23 = arith.constant 0 : index
      %30 = vector.load %arg10[%c0_22, %c0_23] : memref<128x128xbf16, #tpu.memory_space<vmem>>, vector<128x128xbf16>
      tpu.vector_store %arg10[%c0_22, %c0_23], %29 {strides = array<i32>} : memref<128x128xbf16, #tpu.memory_space<vmem>>, vector<128x128xbf16>,
    } else {
    }
    %c0 = arith.constant 0 : index
    %c0_1 = arith.constant 0 : index
    %3 = vector.load %arg9[%c0, %c0_1] : memref<16x128xf32, #tpu.memory_space<vmem>>, vector<16x128xf32>
    %c0_2 = arith.constant 0 : index
    %c0_3 = arith.constant 0 : index
    %4 = vector.load %arg2[%c0_2, %c0_3] : memref<16x1024xbf16, #tpu.memory_space<vmem>>, vector<16x1024xbf16>
    %c0_4 = arith.constant 0 : index
    %c0_5 = arith.constant 0 : index
    %5 = vector.load %arg3[%c0_4, %c0_5] : memref<1024x128xbf16, #tpu.memory_space<vmem>>, vector<1024x128xbf16>
    %cst = arith.constant dense<0.000000e+00> : vector<16x128xf32>
    %6 = tpu.matmul %4, %5, %cst {dimension_numbers = #tpu.dot_dimension_numbers<[1], [0], [0], [1], [0, 0, 1, 1], [], []>} : vector<16x1024xbf16>, vector<1024x128xbf16>, vector<16x128xf32> -> vector<16x128xf32>
    %7 = arith.addf %3, %6 : vector<16x128xf32>
    %c0_6 = arith.constant 0 : index
    %c0_7 = arith.constant 0 : index
    %8 = vector.load %arg9[%c0_6, %c0_7] : memref<16x128xf32, #tpu.memory_space<vmem>>, vector<16x128xf32>
    tpu.vector_store %arg9[%c0_6, %c0_7], %7 {strides = array<i32>} : memref<16x128xf32, #tpu.memory_space<vmem>>, vector<16x128xf32>,
    %c0_i32_8 = arith.constant 0 : i32
    %9 = arith.cmpi eq, %arg1, %c0_i32_8 : i32
    %10 = arith.extui %9 : i1 to i32
    %c0_i32_9 = arith.constant 0 : i32
    %11 = arith.cmpi ne, %10, %c0_i32_9 : i32
    scf.if %11 {
      %c0_10 = arith.constant 0 : index
      %c0_11 = arith.constant 0 : index
      %12 = vector.load %arg9[%c0_10, %c0_11] : memref<16x128xf32, #tpu.memory_space<vmem>>, vector<16x128xf32>
      %c0_12 = arith.constant 0 : index
      %c0_13 = arith.constant 0 : index
      %13 = vector.load %arg4[%c0_12, %c0_13] : memref<1x128xf32, #tpu.memory_space<vmem>>, vector<1x128xf32>
      %14 = vector.broadcast %13 : vector<1x128xf32> to vector<16x128xf32>
      %15 = arith.addf %12, %14 : vector<16x128xf32>
      %16 = arith.mulf %15, %15 : vector<16x128xf32>
      %cst_14 = arith.constant dense<0.000000e+00> : vector<16xf32>
      %17 = vector.multi_reduction <add>, %16, %cst_14 [1] : vector<16x128xf32> to vector<16xf32>
      %18 = vector.shape_cast %17 : vector<16xf32> to vector<16x1xf32>
      %19 = math.sqrt %18 : vector<16x1xf32>
      %cst_15 = arith.constant 9.99999993E-9 : f32
      %20 = vector.broadcast %cst_15 : f32 to vector<16x1xf32>
      %21 = arith.addf %19, %20 : vector<16x1xf32>
      %22 = tpu.reciprocal %21 {approx = true} : vector<16x1xf32> -> vector<16x1xf32>
      %23 = vector.broadcast %22 : vector<16x1xf32> to vector<16x128xf32>
      %24 = arith.mulf %15, %23 : vector<16x128xf32>
      %25 = arith.truncf %24 : vector<16x128xf32> to vector<16x128xbf16>
      %c0_16 = arith.constant 0 : index
      %c0_17 = arith.constant 0 : index
      %26 = vector.load %arg10[%c0_16, %c0_17] : memref<128x128xbf16, #tpu.memory_space<vmem>>, vector<128x128xbf16>
      %cst_18 = arith.constant dense<0.000000e+00> : vector<16x128xf32>
      %27 = tpu.matmul %25, %26, %cst_18 {dimension_numbers = #tpu.dot_dimension_numbers<[1], [1], [0], [0], [0, 0, 1, 0], [], []>} : vector<16x128xbf16>, vector<128x128xbf16>, vector<16x128xf32> -> vector<16x128xf32>
      %c0_19 = arith.constant 0 : index
      %c0_20 = arith.constant 0 : index
      %28 = vector.load %arg8[%c0_19, %c0_20] : memref<16x128xf32, #tpu.memory_space<vmem>>, vector<16x128xf32>
      tpu.vector_store %arg8[%c0_19, %c0_20], %27 {strides = array<i32>} : memref<16x128xf32, #tpu.memory_space<vmem>>, vector<16x128xf32>,
    } else {
    }
    return
  }
  func.func @transform_0(%arg0: i32, %arg1: i32) -> (i32, i32) {
    %c0_i32 = arith.constant 0 : i32
    return %arg0, %arg1 : i32, i32
  }
  func.func @transform_1(%arg0: i32, %arg1: i32) -> (i32, i32) {
    %c0_i32 = arith.constant 0 : i32
    %c0_i32_0 = arith.constant 0 : i32
    return %arg1, %c0_i32 : i32, i32
  }
  func.func @transform_2(%arg0: i32, %arg1: i32) -> (i32, i32) {
    %c0_i32 = arith.constant 0 : i32
    %c0_i32_0 = arith.constant 0 : i32
    %c0_i32_1 = arith.constant 0 : i32
    return %c0_i32, %c0_i32_0 : i32, i32
  }
  func.func @transform_3(%arg0: i32, %arg1: i32) -> (i32, i32) {
    %c0_i32 = arith.constant 0 : i32
    %c0_i32_0 = arith.constant 0 : i32
    %c0_i32_1 = arith.constant 0 : i32
    return %c0_i32, %c0_i32_0 : i32, i32
  }
  func.func @transform_4(%arg0: i32, %arg1: i32) -> (i32, i32) {
    %c0_i32 = arith.constant 0 : i32
    %c0_i32_0 = arith.constant 0 : i32
    %c0_i32_1 = arith.constant 0 : i32
    return %c0_i32, %c0_i32_0 : i32, i32
  }
  func.func @transform_5(%arg0: i32, %arg1: i32) -> (i32, i32) {
    %c0_i32 = arith.constant 0 : i32
    %c0_i32_0 = arith.constant 0 : i32
    %c0_i32_1 = arith.constant 0 : i32
    return %c0_i32, %c0_i32_0 : i32, i32
  }
  func.func @transform_6(%arg0: i32, %arg1: i32) -> (i32, i32) {
    %c0_i32 = arith.constant 0 : i32
    %c0_i32_0 = arith.constant 0 : i32
    return %arg0, %c0_i32 : i32, i32
  }
}

</mosaic_0001>

<bundles_post_ra>
// kernel: tpu_custom_call.1
= control target key start
LH: loop header
LB: loop body
LE: loop exit
PB: predicated region body
PF: predicated region fallthrough
CT: control target
= control target key end

     0   :  { %11 = vsyncpa [#allocation5], 0  ;;  %s2427_s0 = inlined_call_operand.vmem [shape: bf16[16,1024], index: 0, kind: input, shape index: {}]   ;;  %s2428_s1 = inlined_call_operand.hbm [shape: bf16[1024,128], index: 1, kind: input, shape index: {}]   ;;  %s2429_s2 = inlined_call_operand.vmem [shape: f32[1,128], index: 2, kind: input, shape index: {}]   ;;  %s2430_s3 = inlined_call_operand.vmem [shape: bf16[128,64], index: 3, kind: input, shape index: {}]   ;;  %s2431_s4 = inlined_call_operand.vmem [shape: bf16[64,128], index: 4, kind: input, shape index: {}]   ;;  %s2432_s5 = inlined_call_operand.vmem [shape: f32[1,128], index: 5, kind: input, shape index: {}]   ;;  %s2433_s6 = inlined_call_operand.hbm [shape: f32[16,128], index: 6, kind: output, shape index: {}]  }
   0x1   :  { %12 = vsyncpa [#allocation6], 0  ;;  %s19_s23 = sshll.u32 %s2428_s1, 4  ;;  %s2005_s24 = smov [#allocation4]   ;;  %s20_s23 = int_to_ptr.hbm [resolvable:$true] %s19_s23 }
   0x2   :  { %s21_s25 = sshll.u32 %s2005_s24, 4  ;;  %s2006_s26 = smov 64   ;;  %s22_s25 = int_to_ptr.vmem [resolvable:$true] %s21_s25 }
   0x3   :  { %s2007_s27 = smov 4  }
   0x4   :  { %27 = dma.hbm_to_vmem [thread:$0]  %s20_s23, 8192, %s22_s25, [#allocation5], %s2006_s26, %s2006_s26, %s2007_s27  }
   0x5   :  { %2001 = dma.done.wait [#allocation5], 8192  }
   0x6   :  { %2002 = vsyncadd [#allocation5], 4294959104  ;;  %v1745_v0 = vld [vmem:[%s2431_s4 + $0x18] sm:$0xff]  ;;  %v1744_v2 = vld [vmem:[%s2431_s4 + $0x10] sm:$0xff]  ;;  %vm139_vm0 = vcmask 523264   ;;  %s1345_s11 = sshll.u32 %s2433_s6, 4  ;;  %s1346_s11 = int_to_ptr.hbm [resolvable:$true] %s1345_s11 }
   0x7   :  { %v1769_v1 = vld [vmem:[#allocation4 + $0x78] sm:$0xff]  ;;  %168 = vmatpush.bf16.msra.mxu0 %v1745_v0  ;;  %v1768_v4 = vld [vmem:[#allocation4 + $0x70] sm:$0xff]  ;;  %v1743_v6 = vld [vmem:[%s2431_s4 + $0x8] sm:$0xff]  ;;  %s2009_s12 = smov 128  }
   0x8   :  { %v1761_v3 = vld [vmem:[#allocation4 + $0x38] sm:$0xff]  ;;  %1109 = vmatpush.bf16.msra.mxu2 %v1769_v1  ;;  %v1760_v5 = vld [vmem:[#allocation4 + $0x30] sm:$0xff]  ;;  %v1767_v7 = vld [vmem:[#allocation4 + $0x68] sm:$0xff] }
   0x9   :  { %1095 = vmatpush.bf16.msra.mxu1 %v1761_v3  ;;  %v1759_v8 = vld [vmem:[#allocation4 + $0x28] sm:$0xff]  ;;  %v1742_v9 = vld [vmem:[%s2431_s4] sm:$0xff]  ;;  %v1765_v13 = vld [vmem:[#allocation4 + $0x58] sm:$0xff]  ;;  %s2010_s4 = smov 8  }
   0xa   :  { %v1766_v10 = vld [vmem:[#allocation4 + $0x60] sm:$0xff]  ;;  %v1757_v14 = vld [vmem:[#allocation4 + $0x18] sm:$0xff]  ;;  %v1764_v16 = vld [vmem:[#allocation4 + $0x50] sm:$0xff] }
   0xb   :  { %169 = vmatpush.bf16.msra.mxu0 %v1744_v2  ;;  %v1758_v11 = vld [vmem:[#allocation4 + $0x20] sm:$0xff]  ;;  %v1777_v15 = vld [vmem:[#allocation4 + $0xb8] sm:$0xff]  ;;  %v1756_v17 = vld [vmem:[#allocation4 + $0x10] sm:$0xff] }
   0xc   :  { %1110 = vmatpush.bf16.msra.mxu2 %v1768_v4  ;;  %v1734_v12 = vld [vmem:[%s2430_s3] sm:$0xff]  ;;  %1123 = vmatpush.bf16.msra.mxu3 %v1777_v15  ;;  %v1776_v18 = vld [vmem:[#allocation4 + $0xb0] sm:$0xff]  ;;  %v1763_v19 = vld [vmem:[#allocation4 + $0x48] sm:$0xff] }
   0xd   :  { %1096 = vmatpush.bf16.msra.mxu1 %v1760_v5  ;;  %v1755_v20 = vld [vmem:[#allocation4 + $0x8] sm:$0xff]  ;;  %v1762_v21 = vld [vmem:[#allocation4 + $0x40] sm:$0xff]  ;;  %v1793_v22 = vld [vmem:[#allocation4 + $0x138] sm:$0xff] }
   0xe   :  { %v1754_v23 = vld [vmem:[#allocation4] sm:$0xff]  ;;  %v1735_v24 = vld [vmem:[%s2430_s3 + $0x8] sm:$0xff]  ;;  %v1785_v26 = vld [vmem:[#allocation4 + $0xf8] sm:$0xff] }
   0xf   :  { %170 = vmatpush.bf16.msra.mxu0 %v1743_v6  ;;  %v1775_v25 = vld [vmem:[#allocation4 + $0xa8] sm:$0xff]  ;;  %v1792_v27 = vld [vmem:[#allocation4 + $0x130] sm:$0xff]  ;;  %v1774_v28 = vld [vmem:[#allocation4 + $0xa0] sm:$0xff] }
  0x10   :  { %1111 = vmatpush.bf16.msra.mxu2 %v1767_v7  ;;  %1124 = vmatpush.bf16.msra.mxu3 %v1776_v18  ;;  %v1784_v29 = vld [vmem:[#allocation4 + $0xf0] sm:$0xff]  ;;  %v1791_v30 = vld [vmem:[#allocation4 + $0x128] sm:$0xff]  ;;  %v1773_v31 = vld [vmem:[#allocation4 + $0x98] sm:$0xff] }
  0x11   :  { %1097 = vmatpush.bf16.msra.mxu1 %v1759_v8  ;;  %v1783_v32 = vld [vmem:[#allocation4 + $0xe8] sm:$0xff]  ;;  %v1790_v33 = vld [vmem:[#allocation4 + $0x120] sm:$0xff]  ;;  %v1772_v34 = vld [vmem:[#allocation4 + $0x90] sm:$0xff] }
  0x12   :  { %v1782_v35 = vld [vmem:[#allocation4 + $0xe0] sm:$0xff]  ;;  %v1789_v36 = vld [vmem:[#allocation4 + $0x118] sm:$0xff]  ;;  %v1736_v37 = vld [vmem:[%s2430_s3 + $0x10] sm:$0xff] }
  0x13   :  { %171 = vmatpush.bf16.msra.mxu0 %v1742_v9  ;;  %v1771_v38 = vld [vmem:[#allocation4 + $0x88] sm:$0xff]  ;;  %v1781_v39 = vld [vmem:[#allocation4 + $0xd8] sm:$0xff]  ;;  %v1788_v40 = vld [vmem:[#allocation4 + $0x110] sm:$0xff] }
  0x14   :  { %1112 = vmatpush.bf16.msra.mxu2 %v1766_v10  ;;  %1125 = vmatpush.bf16.msra.mxu3 %v1775_v25  ;;  %v1770_v41 = vld [vmem:[#allocation4 + $0x80] sm:$0xff]  ;;  %v1780_v42 = vld [vmem:[#allocation4 + $0xd0] sm:$0xff]  ;;  %v1801_v43 = vld [vmem:[#allocation4 + $0x178] sm:$0xff] }
  0x15   :  { %1098 = vmatpush.bf16.msra.mxu1 %v1758_v11  ;;  %v1746_v44 = vld [vmem:[%s2427_s0 + $0x4] sm:$0xf]  ;;  %v1787_v47 = vld [vmem:[#allocation4 + $0x108] sm:$0xff]  ;;  %v1416_v48 = vld [vmem:[%s2427_s0] sm:$0xf] }
  0x16   :  { %1406 = vmatmul.msk.bf16.vlgmr.msra.gmra.mxu0 %vm139_vm0, %v1734_v12  ;;  %v1418_v45 = vld [vmem:[%s2427_s0 + $0x20] sm:$0xf0]  ;;  %v1750_v49 = vld [vmem:[%s2427_s0 + $0x1c] sm:$0xf0]  ;;  %v1779_v51 = vld [vmem:[#allocation4 + $0xc8] sm:$0xff] }
  0x17   :  { %v1421_v46 = vor.u32 %v1746_v44, %v1418_v45  ;;  %v1417_v50 = vor.u32 %v1750_v49, %v1416_v48  ;;  %v1800_v52 = vld [vmem:[#allocation4 + $0x170] sm:$0xff]  ;;  %v1786_v53 = vld [vmem:[#allocation4 + $0x100] sm:$0xff]  ;;  %v1817_v54 = vld [vmem:[#allocation4 + $0x1f8] sm:$0xff] }
  0x18   :  { %1113 = vmatpush.bf16.msra.mxu2 %v1765_v13  ;;  %1126 = vmatpush.bf16.msra.mxu3 %v1774_v28  ;;  %v1778_v55 = vld [vmem:[#allocation4 + $0xc0] sm:$0xff]  ;;  %v1799_v56 = vld [vmem:[#allocation4 + $0x168] sm:$0xff]  ;;  %v1809_v57 = vld [vmem:[#allocation4 + $0x1b8] sm:$0xff] }
  0x19   :  { %1099 = vmatpush.bf16.msra.mxu1 %v1757_v14  ;;  %v1737_v58 = vld [vmem:[%s2430_s3 + $0x18] sm:$0xff]  ;;  %v1816_v59 = vld [vmem:[#allocation4 + $0x1f0] sm:$0xff]  ;;  %v1798_v60 = vld [vmem:[#allocation4 + $0x160] sm:$0xff] }
  0x1a   :  { %v1808_v61 = vld [vmem:[#allocation4 + $0x1b0] sm:$0xff]  ;;  %v1815_v62 = vld [vmem:[#allocation4 + $0x1e8] sm:$0xff]  ;;  %v1797_v2 = vld [vmem:[#allocation4 + $0x158] sm:$0xff] }
  0x1b   :  { %v1424_v63 = vld [vmem:[%s2427_s0 + $0x8] sm:$0xf]  ;;  %v1432_v3 = vld [vmem:[%s2427_s0 + $0x10] sm:$0xf]  ;;  %v1747_v7 = vld [vmem:[%s2427_s0 + $0xc] sm:$0xf] }
  0x1c   :  { %1114 = vmatpush.bf16.msra.mxu2 %v1764_v16  ;;  %1127 = vmatpush.bf16.msra.mxu3 %v1773_v31  ;;  %v1751_v0 = vld [vmem:[%s2427_s0 + $0x24] sm:$0xf0]  ;;  %v1752_v5 = vld [vmem:[%s2427_s0 + $0x2c] sm:$0xf0]  ;;  %v1426_v8 = vld [vmem:[%s2427_s0 + $0x28] sm:$0xf0] }
  0x1d   :  { %1100 = vmatpush.bf16.msra.mxu1 %v1756_v17  ;;  %v1425_v1 = vor.u32 %v1751_v0, %v1424_v63  ;;  %v1807_v4 = vld [vmem:[#allocation4 + $0x1a8] sm:$0xff]  ;;  %v1433_v6 = vor.u32 %v1752_v5, %v1432_v3  ;;  %v1814_v9 = vld [vmem:[#allocation4 + $0x1e0] sm:$0xff]  ;;  %v1429_v10 = vor.u32 %v1747_v7, %v1426_v8  ;;  %v1796_v11 = vld [vmem:[#allocation4 + $0x150] sm:$0xff] }
  0x1e   :  { %v1806_v12 = vld [vmem:[#allocation4 + $0x1a0] sm:$0xff]  ;;  %v1813_v13 = vld [vmem:[#allocation4 + $0x1d8] sm:$0xff]  ;;  %v1795_v14 = vld [vmem:[#allocation4 + $0x148] sm:$0xff] }
  0x1f   :  { %v1805_v15 = vld [vmem:[#allocation4 + $0x198] sm:$0xff]  ;;  %v1738_v16 = vld [vmem:[%s2430_s3 + $0x20] sm:$0xff]  ;;  %v1812_v17 = vld [vmem:[#allocation4 + $0x1d0] sm:$0xff] }
  0x20   :  { %1115 = vmatpush.bf16.msra.mxu2 %v1763_v19  ;;  %1128 = vmatpush.bf16.msra.mxu3 %v1772_v34  ;;  %v1794_v18 = vld [vmem:[#allocation4 + $0x140] sm:$0xff]  ;;  %v1804_v19 = vld [vmem:[#allocation4 + $0x190] sm:$0xff] }
  0x21   :  { %1101 = vmatpush.bf16.msra.mxu1 %v1755_v20  ;;  %v1811_v20 = vld [vmem:[#allocation4 + $0x1c8] sm:$0xff]  ;;  %v1810_v25 = vld [vmem:[#allocation4 + $0x1c0] sm:$0xff]  ;;  %v1740_v34 = vld [vmem:[%s2430_s3 + $0x30] sm:$0xff] }
  0x22   :  { %v1802_v28 = vld [vmem:[#allocation4 + $0x180] sm:$0xff] }
  0x24   :  { %1116 = vmatpush.bf16.msra.mxu2 %v1762_v21  ;;  %1129 = vmatpush.bf16.msra.mxu3 %v1771_v38  ;;  %v1748_v21 = vld [vmem:[%s2427_s0 + $0x14] sm:$0xf] }
  0x25   :  { %1102 = vmatpush.bf16.msra.mxu1 %v1754_v23 }
  0x26   :  { %1407 = vmatmul.msk.bf16.gmra.mxu0 %vm139_vm0, %v1735_v24  ;;  %v1803_v24 = vld [vmem:[#allocation4 + $0x188] sm:$0xff] }
  0x27   :  { %1117 = vmatmul.bf16.vlgmr.msra.gmra.mxu2 %v1421_v46 }
  0x28   :  { %1151 = vmatpush.bf16.msrb.mxu2 %v1793_v22  ;;  %1130 = vmatpush.bf16.msra.mxu3 %v1770_v41  ;;  %v1434_v22 = vld [vmem:[%s2427_s0 + $0x30] sm:$0xf0] }
  0x29   :  { %1137 = vmatpush.bf16.msrb.mxu1 %v1785_v26  ;;  %v1437_v23 = vor.u32 %v1748_v21, %v1434_v22  ;;  %v1749_v26 = vld [vmem:[%s2427_s0 + $0x1c] sm:$0xf] }
  0x2a   :  { %1103 = vmatmul.bf16.vlgmr.msra.gmra.mxu1 %v1417_v50 }
  0x2b   :  { %1131 = vmatmul.bf16.vlgmr.msra.gmra.mxu3 %v1425_v1 }
  0x2c   :  { %1152 = vmatpush.bf16.msrb.mxu2 %v1792_v27  ;;  %1165 = vmatpush.bf16.msrb.mxu3 %v1801_v43  ;;  %v1442_v27 = vld [vmem:[%s2427_s0 + $0x38] sm:$0xf0] }
  0x2d   :  { %1138 = vmatpush.bf16.msrb.mxu1 %v1784_v29  ;;  %v1440_v29 = vld [vmem:[%s2427_s0 + $0x18] sm:$0xf]  ;;  %v1445_v31 = vor.u32 %v1749_v26, %v1442_v27 }
  0x30   :  { %1153 = vmatpush.bf16.msrb.mxu2 %v1791_v30  ;;  %1166 = vmatpush.bf16.msrb.mxu3 %v1800_v52  ;;  %v1753_v30 = vld [vmem:[%s2427_s0 + $0x34] sm:$0xf0]  ;;  %v2156_v52 = vld [vmem:[%s2432_s5] ss:$0 sm:$0xff] }
  0x31   :  { %1139 = vmatpush.bf16.msrb.mxu1 %v1783_v32  ;;  %v1441_v32 = vor.u32 %v1753_v30, %v1440_v29 }
  0x34   :  { %1154 = vmatpush.bf16.msrb.mxu2 %v1790_v33  ;;  %1167 = vmatpush.bf16.msrb.mxu3 %v1799_v56  ;;  %v1739_v33 = vld [vmem:[%s2430_s3 + $0x28] sm:$0xff] }
  0x35   :  { %1140 = vmatpush.bf16.msrb.mxu1 %v1782_v35  ;;  %v1741_v35 = vld [vmem:[%s2430_s3 + $0x38] sm:$0xff] }
  0x36   :  { %1408 = vmatmul.msk.bf16.gmra.mxu0 %vm139_vm0, %v1736_v37 }
  0x38   :  { %1155 = vmatpush.bf16.msrb.mxu2 %v1789_v36  ;;  %1168 = vmatpush.bf16.msrb.mxu3 %v1798_v60 }
  0x39   :  { %1141 = vmatpush.bf16.msrb.mxu1 %v1781_v39 }
  0x3c   :  { %1156 = vmatpush.bf16.msrb.mxu2 %v1788_v40  ;;  %1169 = vmatpush.bf16.msrb.mxu3 %v1797_v2 }
  0x3d   :  { %1142 = vmatpush.bf16.msrb.mxu1 %v1780_v42 }
  0x40   :  { %1157 = vmatpush.bf16.msrb.mxu2 %v1787_v47  ;;  %1170 = vmatpush.bf16.msrb.mxu3 %v1796_v11 }
  0x41   :  { %1143 = vmatpush.bf16.msrb.mxu1 %v1779_v51 }
  0x44   :  { %1158 = vmatpush.bf16.msrb.mxu2 %v1786_v53  ;;  %1171 = vmatpush.bf16.msrb.mxu3 %v1795_v14 }
  0x45   :  { %1144 = vmatpush.bf16.msrb.mxu1 %v1778_v55 }
  0x46   :  { %1409 = vmatmul.msk.bf16.gmra.mxu0 %vm139_vm0, %v1737_v58 }
  0x47   :  { %1159 = vmatmul.bf16.vlgmr.msrb.gmra.mxu2 %v1433_v6 }
  0x48   :  { %1193 = vmatpush.bf16.msra.mxu2 %v1817_v54  ;;  %1145 = vmatmul.bf16.vlgmr.msrb.gmra.mxu1 %v1429_v10 }
  0x49   :  { %1179 = vmatpush.bf16.msra.mxu1 %v1809_v57  ;;  %1172 = vmatpush.bf16.msrb.mxu3 %v1794_v18 }
  0x4c   :  { %1194 = vmatpush.bf16.msra.mxu2 %v1816_v59  ;;  %1173 = vmatmul.bf16.vlgmr.msrb.gmra.mxu3 %v1437_v23 }
  0x4d   :  { %1180 = vmatpush.bf16.msra.mxu1 %v1808_v61 }
  0x50   :  { %1195 = vmatpush.bf16.msra.mxu2 %v1815_v62 }
  0x51   :  { %1181 = vmatpush.bf16.msra.mxu1 %v1807_v4 }
  0x54   :  { %1196 = vmatpush.bf16.msra.mxu2 %v1814_v9 }
  0x55   :  { %1182 = vmatpush.bf16.msra.mxu1 %v1806_v12 }
  0x56   :  { %1410 = vmatmul.msk.bf16.gmra.mxu0 %vm139_vm0, %v1738_v16 }
  0x58   :  { %1197 = vmatpush.bf16.msra.mxu2 %v1813_v13 }
  0x59   :  { %1183 = vmatpush.bf16.msra.mxu1 %v1805_v15 }
  0x5c   :  { %1198 = vmatpush.bf16.msra.mxu2 %v1812_v17 }
  0x5d   :  { %1184 = vmatpush.bf16.msra.mxu1 %v1804_v19 }
  0x60   :  { %1199 = vmatpush.bf16.msra.mxu2 %v1811_v20 }
  0x61   :  { %1185 = vmatpush.bf16.msra.mxu1 %v1803_v24 }
  0x64   :  { %1200 = vmatpush.bf16.msra.mxu2 %v1810_v25 }
  0x65   :  { %1186 = vmatpush.bf16.msra.mxu1 %v1802_v28  ;;  %v1880_v28 = vld [vmem:[%s2429_s2] ss:$0 sm:$0xff]  ;;  %s2008_s2 = smov [#allocation7]  }
  0x66   :  { %1411 = vmatmul.msk.bf16.gmra.mxu0 %vm139_vm0, %v1739_v33  ;;  %s1343_s8 = sshll.u32 %s2008_s2, 4  ;;  %s1344_s8 = int_to_ptr.vmem [resolvable:$true] %s1343_s8 }
  0x67   :  { %1201 = vmatmul.bf16.vlgmr.msra.gmra.mxu2 %v1445_v31 }
  0x68   :  { %1187 = vmatmul.bf16.vlgmr.msra.gmra.mxu1 %v1441_v32 }
  0x76   :  { %1412 = vmatmul.msk.bf16.gmra.mxu0 %vm139_vm0, %v1740_v34 }
  0x86   :  { %1413 = vmatmul.msk.bf16.gmra.mxu0 %vm139_vm0, %v1741_v35 }
  0x93   :  { %v173_v36 = vpop.f32.mrf.mxu0 }
  0x94   :  { %v2192_v24 = vadd.f32 %v2156_v52, %v173_v36 }
  0x96   :  { %v213_v32 = vmul.f32 %v2192_v24, %v2192_v24 }
  0x9b   :  { %v2141_v37 = vpop.f32.mrf.mxu0 }
  0xa3   :  { %v2143_v38 = vpop.f32.mrf.mxu0 }
  0xa7   :  { %v1104_v44 = vpop.f32.mrf.mxu1 }
  0xaa   :  { %v1118_v45 = vpop.f32.mrf.mxu2 }
  0xab   :  { %v2145_v39 = vpop.f32.mrf.mxu0  ;;  %v1119_v14 = vadd.f32 %v1118_v45, %v1104_v44 }
  0xae   :  { %v1132_v50 = vpop.f32.mrf.mxu3 }
  0xaf   :  { %v1106_v47 = vpop.f32.mrf.mxu1  ;;  %v1133_v20 = vadd.f32 %v1132_v50, %v1119_v14 }
  0xb2   :  { %v1120_v48 = vpop.f32.mrf.mxu2 }
  0xb3   :  { %v2147_v40 = vpop.f32.mrf.mxu0  ;;  %v1121_v61 = vadd.f32 %v1120_v48, %v1106_v47 }
  0xb4   :  { %v2210_v35 = vadd.f32 %v2156_v52, %v2147_v40  ;;  %v2223_v40 = vadd.f32 %v2156_v52, %v2145_v39 }
  0xb6   :  { %v1134_v57 = vpop.f32.mrf.mxu3  ;;  %v217_v47 = vmul.f32 %v2210_v35, %v2210_v35 }
  0xb7   :  { %v1135_v1 = vadd.f32 %v1134_v57, %v1121_v61  ;;  %v2245_v57 = vadd.f32 %v2156_v52, %v2143_v38 }
  0xbb   :  { %v185_v41 = vpop.f32.mrf.mxu0 }
  0xbc   :  { %v2179_v11 = vadd.f32 %v2156_v52, %v185_v41 }
  0xbe   :  { %v218_v18 = vmul.f32 %v2179_v11, %v2179_v11 }
  0xc3   :  { %v188_v42 = vpop.f32.mrf.mxu0 }
  0xc4   :  { %v2169_v2 = vadd.f32 %v2156_v52, %v188_v42 }
  0xc5   :  { %v1146_v51 = vpop.f32.mrf.mxu1 }
  0xc6   :  { %v219_v8 = vmul.f32 %v2169_v2, %v2169_v2  ;;  %v1147_v26 = vadd.f32 %v1146_v51, %v1133_v20 }
  0xca   :  { %v1160_v55 = vpop.f32.mrf.mxu2 }
  0xcb   :  { %v2149_v43 = vpop.f32.mrf.mxu0  ;;  %v1161_v33 = vadd.f32 %v1160_v55, %v1147_v26 }
  0xcd   :  { %v1148_v58 = vpop.f32.mrf.mxu1 }
  0xce   :  { %v1149_v6 = vadd.f32 %v1148_v58, %v1135_v1  ;;  %v215_v58 = vmul.f32 %v2245_v57, %v2245_v57 }
  0xcf   :  { %v1174_v0 = vpop.f32.mrf.mxu3 }
  0xd0   :  { %v1175_v41 = vadd.f32 %v1174_v0, %v1161_v33 }
  0xd2   :  { %v1162_v63 = vpop.f32.mrf.mxu2 }
  0xd3   :  { %v2151_v46 = vpop.f32.mrf.mxu0  ;;  %v1163_v10 = vadd.f32 %v1162_v63, %v1149_v6 }
  0xd7   :  { %v1176_v12 = vpop.f32.mrf.mxu3 }
  0xd8   :  { %v1177_v16 = vadd.f32 %v1176_v12, %v1163_v10 }
  0xdb   :  { %v195_v49 = vpop.f32.mrf.mxu0 }
  0xdc   :  { %v2189_v22 = vadd.f32 %v2156_v52, %v195_v49  ;;  %v2227_v49 = vadd.f32 %v2156_v52, %v2151_v46 }
  0xde   :  { %v222_v31 = vmul.f32 %v2189_v22, %v2189_v22  ;;  %v221_v51 = vmul.f32 %v2227_v49, %v2227_v49 }
  0xe3   :  { %v198_v53 = vpop.f32.mrf.mxu0 }
  0xe4   :  { %v2159_v54 = vadd.f32 %v2156_v52, %v198_v53  ;;  %v216_v53 = vmul.f32 %v2223_v40, %v2223_v40 }
  0xe5   :  { %v1188_v5 = vpop.f32.mrf.mxu1 }
  0xe6   :  { %v223_v56 = vmul.f32 %v2159_v54, %v2159_v54  ;;  %v1189_v48 = vadd.f32 %v1188_v5, %v1175_v41 }
  0xe8   :  { %249 = vadd.xlane.f32.xlu2 %v223_v56  ;;  %v2237_v56 = vadd.f32 %v2156_v52, %v2149_v43  ;;  %v2251_v43 = vadd.f32 %v2156_v52, %v2141_v37 }
  0xea   :  { %v1202_v9 = vpop.f32.mrf.mxu2  ;;  %v220_v46 = vmul.f32 %v2237_v56, %v2237_v56 }
  0xeb   :  { %v200_v59 = vpop.f32.mrf.mxu0  ;;  %v1203_v50 = vadd.f32 %v1202_v9, %v1189_v48 }
  0xec   :  { %v2164_v60 = vadd.f32 %v2156_v52, %v200_v59  ;;  %v214_v59 = vmul.f32 %v2251_v43, %v2251_v43 }
  0xed   :  { %v1190_v19 = vpop.f32.mrf.mxu1  ;;  %v2233_v55 = vadd.f32 %v1880_v28, %v1203_v50 }
  0xee   :  { %v224_v62 = vmul.f32 %v2164_v60, %v2164_v60  ;;  %v1191_v21 = vadd.f32 %v1190_v19, %v1177_v16 }
  0xef   :  { %v1222_v39 = vmul.f32 %v2233_v55, %v2233_v55 }
  0xf0   :  { %251 = vadd.xlane.f32.xlu2 %v224_v62 }
  0xf2   :  { %v1204_v23 = vpop.f32.mrf.mxu2 }
  0xf3   :  { %v203_v3 = vpop.f32.mrf.mxu0  ;;  %v1205_v29 = vadd.f32 %v1204_v23, %v1191_v21 }
  0xf4   :  { %v2172_v4 = vadd.f32 %v2156_v52, %v203_v3 }
  0xf5   :  { %v2206_v34 = vadd.f32 %v1880_v28, %v1205_v29 }
  0xf6   :  { %v225_v7 = vmul.f32 %v2172_v4, %v2172_v4 }
  0xf7   :  { %v1223_v44 = vmul.f32 %v2206_v34, %v2206_v34 }
  0xf8   :  { %253 = vadd.xlane.f32.xlu1 %v225_v7  ;;  %241 = vadd.xlane.f32.xlu2 %v219_v8 }
  0xfb   :  { %v205_v13 = vpop.f32.mrf.mxu0 }
  0xfc   :  { %v2182_v15 = vadd.f32 %v2156_v52, %v205_v13 }
  0xfe   :  { %v226_v17 = vmul.f32 %v2182_v15, %v2182_v15 }
 0x100   :  { %255 = vadd.xlane.f32.xlu1 %v226_v17  ;;  %239 = vadd.xlane.f32.xlu2 %v218_v18 }
 0x103   :  { %v208_v25 = vpop.f32.mrf.mxu0 }
 0x104   :  { %v2195_v27 = vadd.f32 %v2156_v52, %v208_v25 }
 0x106   :  { %v227_v30 = vmul.f32 %v2195_v27, %v2195_v27 }
 0x108   :  { %257 = vadd.xlane.f32.xlu0 %v227_v30  ;;  %247 = vadd.xlane.f32.xlu1 %v222_v31 }
 0x109   :  { %229 = vadd.xlane.f32.xlu2 %v213_v32 }
 0x10b   :  { %v210_v36 = vpop.f32.mrf.mxu0 }
 0x10c   :  { %v2213_v42 = vadd.f32 %v2156_v52, %v210_v36 }
 0x10e   :  { %v228_v45 = vmul.f32 %v2213_v42, %v2213_v42 }
 0x110   :  { %259 = vadd.xlane.f32.xlu0 %v228_v45  ;;  %237 = vadd.xlane.f32.xlu1 %v217_v47 }
 0x111   :  { %1226 = vadd.xlane.f32.xlu2 %v1223_v44 }
 0x118   :  { %245 = vadd.xlane.f32.xlu0 %v221_v51  ;;  %235 = vadd.xlane.f32.xlu1 %v216_v53 }
 0x120   :  { %243 = vadd.xlane.f32.xlu0 %v220_v46  ;;  %1224 = vadd.xlane.f32.xlu1 %v1222_v39 }
 0x128   :  { %233 = vadd.xlane.f32.xlu0 %v215_v58 }
 0x130   :  { %231 = vadd.xlane.f32.xlu0 %v214_v59 }
 0x15b   :  { %v250_v61 = vpop.xlane.xlu2 %249 }
 0x15c   :  { %1881 = vrsqrt.f32 %v250_v61  ;;  %vm388_vm1 = vcmp.eq.f32.partialorder %v250_v61, inf  ;;  %v391_v13 = vand.u32 2147483648, %v250_v61  ;;  %vm390_vm2 = vcmp.eq.f32.partialorder %v250_v61, 0.0 }
 0x162   :  { %v1882_v62 = vpop.eup %1881 }
 0x163   :  { %v382_v63 = vmul.f32 %v1882_v62, %v250_v61  ;;  %v252_v0 = vpop.xlane.xlu2 %251 }
 0x164   :  { %1883 = vrsqrt.f32 %v252_v0  ;;  %vm400_vm3 = vcmp.eq.f32.partialorder %v252_v0, inf  ;;  %v403_v28 = vand.u32 2147483648, %v252_v0  ;;  %vm402_vm4 = vcmp.eq.f32.partialorder %v252_v0, 0.0 }
 0x165   :  { %v383_v38 = vmul.f32 %v1882_v62, %v382_v63 }
 0x167   :  { %v384_v1 = vmul.f32 0.5, %v383_v38 }
 0x169   :  { %v385_v3 = vsub.f32 1.5, %v384_v1 }
 0x16a   :  { %v1884_v5 = vpop.eup %1883 }
 0x16b   :  { %v386_v6 = vmul.f32 %v1882_v62, %v385_v3  ;;  %v394_v7 = vmul.f32 %v1884_v5, %v252_v0  ;;  %v254_v8 = vpop.xlane.xlu1 %253  ;;  %v2255_v9 = vpop.xlane.xlu2 %241 }
 0x16c   :  { %1885 = vrsqrt.f32 %v254_v8  ;;  %vm412_vm5 = vcmp.eq.f32.partialorder %v254_v8, inf  ;;  %vm414_vm6 = vcmp.eq.f32.partialorder %v254_v8, 0.0 }
 0x16d   :  { %v387_v37 = vmul.f32 %v386_v6, %v250_v61  ;;  %v395_v52 = vmul.f32 %v1884_v5, %v394_v7 }
 0x16f   :  { %v389_v10 = vsel %vm388_vm1, %v250_v61, %v387_v37  ;;  %v396_v12 = vmul.f32 0.5, %v395_v52  ;;  %v415_v61 = vand.u32 2147483648, %v254_v8 }
 0x170   :  { %v392_v17 = vsel %vm390_vm2, %v391_v13, %v389_v10 }
 0x171   :  { %v397_v14 = vsub.f32 1.5, %v396_v12  ;;  %v463_v23 = vadd.f32 1e-08, %v392_v17 }
 0x172   :  { %v1886_v16 = vpop.eup %1885 }
 0x173   :  { %v398_v18 = vmul.f32 %v1884_v5, %v397_v14  ;;  %v406_v19 = vmul.f32 %v1886_v16, %v254_v8  ;;  %v2257_v20 = vpop.xlane.xlu1 %255  ;;  %v2259_v21 = vpop.xlane.xlu2 %239 }
 0x174   :  { %1887 = vrsqrt.f32 %v2257_v20  ;;  %vm424_vm7 = vcmp.eq.f32.partialorder %v2257_v20, inf  ;;  %vm426_vm8 = vcmp.eq.f32.partialorder %v2257_v20, 0.0  ;;  %vm328_vm10 = vcmp.eq.f32.partialorder %v2259_v21, inf }
 0x175   :  { %v399_v25 = vmul.f32 %v398_v18, %v252_v0  ;;  %v407_v26 = vmul.f32 %v1886_v16, %v406_v19  ;;  %1889 = vrsqrt.f32 %v2259_v21  ;;  %v427_v19 = vand.u32 2147483648, %v2257_v20 }
 0x176   :  { %1891 = vrsqrt.f32 %v2255_v9  ;;  %vm330_vm11 = vcmp.eq.f32.partialorder %v2259_v21, 0.0 }
 0x177   :  { %v401_v29 = vsel %vm400_vm3, %v252_v0, %v399_v25  ;;  %v408_v30 = vmul.f32 0.5, %v407_v26  ;;  %1893 = vrcp.f32 %v463_v23  ;;  %vm340_vm3 = vcmp.eq.f32.partialorder %v2255_v9, inf }
 0x178   :  { %v404_v31 = vsel %vm402_vm4, %v403_v28, %v401_v29 }
 0x179   :  { %v464_v32 = vadd.f32 1e-08, %v404_v31  ;;  %v409_v33 = vsub.f32 1.5, %v408_v30 }
 0x17a   :  { %v1888_v36 = vpop.eup %1887 }
 0x17b   :  { %v1890_v41 = vpop.eup %1889  ;;  %1895 = vrcp.f32 %v464_v32  ;;  %v410_v44 = vmul.f32 %v1886_v16, %v409_v33  ;;  %v418_v45 = vmul.f32 %v1888_v36, %v2257_v20  ;;  %v2265_v47 = vpop.xlane.xlu0 %257 }
 0x17c   :  { %v2267_v48 = vpop.xlane.xlu1 %247  ;;  %v322_v50 = vmul.f32 %v1890_v41, %v2259_v21  ;;  %1897 = vrsqrt.f32 %v2265_v47  ;;  %v2271_v39 = vpop.eup %1891  ;;  %vm436_vm9 = vcmp.eq.f32.partialorder %v2265_v47, inf  ;;  %vm438_vm12 = vcmp.eq.f32.partialorder %v2265_v47, 0.0 }
 0x17d   :  { %v411_v51 = vmul.f32 %v410_v44, %v254_v8  ;;  %v419_v53 = vmul.f32 %v1888_v36, %v418_v45  ;;  %1899 = vrsqrt.f32 %v2267_v48  ;;  %v1894_v58 = vpop.eup %1893  ;;  %v334_v7 = vmul.f32 %v2271_v39, %v2255_v9  ;;  %v2292_v32 = vpop.xlane.xlu2 %229 }
 0x17e   :  { %v323_v46 = vmul.f32 %v1890_v41, %v322_v50  ;;  %v495_v5 = vmul.f32 %v1894_v58, %v2159_v54  ;;  %vm376_vm1 = vcmp.eq.f32.partialorder %v2267_v48, inf  ;;  %vm378_vm2 = vcmp.eq.f32.partialorder %v2267_v48, 0.0 }
 0x17f   :  { %v413_v59 = vsel %vm412_vm5, %v254_v8, %v411_v51  ;;  %v420_v62 = vmul.f32 0.5, %v419_v53 }
 0x180   :  { %v324_v63 = vmul.f32 0.5, %v323_v46  ;;  %v416_v38 = vsel %vm414_vm6, %v415_v61, %v413_v59  ;;  %vm342_vm6 = vcmp.eq.f32.partialorder %v2255_v9, 0.0 }
 0x181   :  { %v1896_v0 = vpop.eup %1895  ;;  %v421_v1 = vsub.f32 1.5, %v420_v62  ;;  %v465_v14 = vadd.f32 1e-08, %v416_v38 }
 0x182   :  { %v1898_v3 = vpop.eup %1897  ;;  %v496_v6 = vmul.f32 %v1896_v0, %v2164_v60  ;;  %v325_v16 = vsub.f32 1.5, %v324_v63  ;;  %v335_v60 = vmul.f32 %v2271_v39, %v334_v7 }
 0x183   :  { %v422_v37 = vmul.f32 %v1888_v36, %v421_v1  ;;  %v430_v52 = vmul.f32 %v1898_v3, %v2265_v47  ;;  %v2279_v10 = vpop.xlane.xlu0 %259  ;;  %v1900_v8 = vpop.eup %1899 }
 0x184   :  { %v2281_v12 = vpop.xlane.xlu1 %237  ;;  %v1854_v13 = vpack.c.bf16 %v496_v6, %v495_v5  ;;  %v370_v54 = vmul.f32 %v1900_v8, %v2267_v48  ;;  %1901 = vrsqrt.f32 %v2279_v10  ;;  %v326_v30 = vmul.f32 %v1890_v41, %v325_v16 }
 0x185   :  { %v423_v17 = vmul.f32 %v422_v37, %v2257_v20  ;;  %v431_v18 = vmul.f32 %v1898_v3, %v430_v52  ;;  %1903 = vrsqrt.f32 %v2281_v12  ;;  %v336_v33 = vmul.f32 0.5, %v335_v60 }
 0x186   :  { %1870 = vst [vmem:[#allocation3 + $0x20] sm:$0xff] %v1854_v13   ;;  %v371_v26 = vmul.f32 %v1900_v8, %v370_v54  ;;  %1905 = vrcp.f32 %v465_v14  ;;  %v327_v53 = vmul.f32 %v326_v30, %v2259_v21  ;;  %v331_v5 = vand.u32 2147483648, %v2259_v21 }
 0x187   :  { %v425_v23 = vsel %vm424_vm7, %v2257_v20, %v423_v17  ;;  %v432_v25 = vmul.f32 0.5, %v431_v18  ;;  %v337_v58 = vsub.f32 1.5, %v336_v33  ;;  %v439_v6 = vand.u32 2147483648, %v2265_v47 }
 0x188   :  { %v428_v28 = vsel %vm426_vm8, %v427_v19, %v425_v23  ;;  %v372_v45 = vmul.f32 0.5, %v371_v26  ;;  %vm448_vm13 = vcmp.eq.f32.partialorder %v2279_v10, inf  ;;  %vm450_vm14 = vcmp.eq.f32.partialorder %v2279_v10, 0.0 }
 0x189   :  { %v466_v29 = vadd.f32 1e-08, %v428_v28  ;;  %v433_v31 = vsub.f32 1.5, %v432_v25  ;;  %v338_v16 = vmul.f32 %v2271_v39, %v337_v58  ;;  %v451_v39 = vand.u32 2147483648, %v2279_v10 }
 0x18a   :  { %v1902_v36 = vpop.eup %1901  ;;  %v373_v62 = vsub.f32 1.5, %v372_v45  ;;  %vm316_vm15 = vcmp.eq.f32.partialorder %v2281_v12, inf  ;;  %vm318_vm0 = vcmp.eq.f32.partialorder %v2281_v12, 0.0 }
 0x18b   :  { %1907 = vrcp.f32 %v466_v29  ;;  %v434_v44 = vmul.f32 %v1898_v3, %v433_v31  ;;  %v2294_v50 = vpop.xlane.xlu0 %245  ;;  %v1904_v51 = vpop.eup %1903  ;;  %v442_v20 = vmul.f32 %v1902_v36, %v2279_v10  ;;  %v329_v3 = vsel %vm328_vm10, %v2259_v21, %v327_v53 }
 0x18c   :  { %1909 = vrsqrt.f32 %v2292_v32  ;;  %v310_v41 = vmul.f32 %v1904_v51, %v2281_v12  ;;  %v1906_v61 = vpop.eup %1905  ;;  %v374_v18 = vmul.f32 %v1900_v8, %v373_v62  ;;  %v332_v23 = vsel %vm330_vm11, %v331_v5, %v329_v3 }
 0x18d   :  { %v435_v46 = vmul.f32 %v434_v44, %v2265_v47  ;;  %v443_v59 = vmul.f32 %v1902_v36, %v442_v20  ;;  %1911 = vrsqrt.f32 %v2294_v50  ;;  %v497_v52 = vmul.f32 %v1906_v61, %v2172_v4  ;;  %v2320_v4 = vpop.xlane.xlu1 %235 }
 0x18e   :  { %v311_v63 = vmul.f32 %v1904_v51, %v310_v41  ;;  %v458_v29 = vadd.f32 1e-08, %v332_v23  ;;  %v375_v30 = vmul.f32 %v374_v18, %v2267_v48  ;;  %1913 = vrsqrt.f32 %v2320_v4 }
 0x18f   :  { %v437_v0 = vsel %vm436_vm9, %v2265_v47, %v435_v46  ;;  %v444_v38 = vmul.f32 0.5, %v443_v59  ;;  %v339_v62 = vmul.f32 %v338_v16, %v2255_v9  ;;  %vm364_vm4 = vcmp.eq.f32.partialorder %v2294_v50, inf }
 0x190   :  { %v312_v7 = vmul.f32 0.5, %v311_v63  ;;  %v440_v17 = vsel %vm438_vm12, %v439_v6, %v437_v0  ;;  %v377_v41 = vsel %vm376_vm1, %v2267_v48, %v375_v30  ;;  %vm366_vm5 = vcmp.eq.f32.partialorder %v2294_v50, 0.0 }
 0x191   :  { %v1908_v1 = vpop.eup %1907  ;;  %v445_v14 = vsub.f32 1.5, %v444_v38  ;;  %v467_v26 = vadd.f32 1e-08, %v440_v17  ;;  %vm304_vm7 = vcmp.eq.f32.partialorder %v2320_v4, inf  ;;  %vm306_vm8 = vcmp.eq.f32.partialorder %v2320_v4, 0.0 }
 0x192   :  { %v2309_v37 = vpop.eup %1909  ;;  %v498_v13 = vmul.f32 %v1908_v1, %v2182_v15  ;;  %v313_v54 = vsub.f32 1.5, %v312_v7  ;;  %v343_v7 = vand.u32 2147483648, %v2255_v9  ;;  %vm268_vm11 = vcmp.eq.f32.partialorder %v2292_v32, inf }
 0x193   :  { %v2315_v60 = vpop.xlane.xlu0 %243  ;;  %v446_v25 = vmul.f32 %v1902_v36, %v445_v14  ;;  %v1912_v15 = vpop.eup %1911  ;;  %v262_v47 = vmul.f32 %v2309_v37, %v2292_v32  ;;  %v319_v36 = vand.u32 2147483648, %v2281_v12 }
 0x194   :  { %v1859_v19 = vpack.c.bf16 %v498_v13, %v497_v52  ;;  %v314_v8 = vmul.f32 %v1904_v51, %v313_v54  ;;  %v358_v21 = vmul.f32 %v1912_v15, %v2294_v50  ;;  %1915 = vrsqrt.f32 %v2315_v60 }
 0x195   :  { %v447_v28 = vmul.f32 %v446_v25, %v2279_v10  ;;  %v263_v45 = vmul.f32 %v2309_v37, %v262_v47  ;;  %1917 = vrcp.f32 %v467_v26  ;;  %vm352_vm9 = vcmp.eq.f32.partialorder %v2315_v60, inf }
 0x196   :  { %1871 = vst [vmem:[#allocation3 + $0x28] sm:$0xff] %v1859_v19   ;;  %v315_v31 = vmul.f32 %v314_v8, %v2281_v12  ;;  %v359_v44 = vmul.f32 %v1912_v15, %v358_v21  ;;  %1919 = vrcp.f32 %v458_v29  ;;  %v367_v19 = vand.u32 2147483648, %v2294_v50 }
 0x197   :  { %v449_v33 = vsel %vm448_vm13, %v2279_v10, %v447_v28  ;;  %v379_v10 = vand.u32 2147483648, %v2267_v48  ;;  %v264_v63 = vmul.f32 0.5, %v263_v45  ;;  %v341_v48 = vsel %vm340_vm3, %v2255_v9, %v339_v62 }
 0x198   :  { %v452_v51 = vsel %vm450_vm14, %v451_v39, %v449_v33  ;;  %v317_v20 = vsel %vm316_vm15, %v2281_v12, %v315_v31  ;;  %v360_v59 = vmul.f32 0.5, %v359_v44  ;;  %v1914_v12 = vpop.eup %1913  ;;  %vm354_vm10 = vcmp.eq.f32.partialorder %v2315_v60, 0.0 }
 0x199   :  { %v468_v53 = vadd.f32 1e-08, %v452_v51  ;;  %v320_v46 = vsel %vm318_vm0, %v319_v36, %v317_v20  ;;  %v380_v38 = vsel %vm378_vm2, %v379_v10, %v377_v41  ;;  %v298_v1 = vmul.f32 %v1914_v12, %v2320_v4 }
 0x19a   :  { %v457_v58 = vadd.f32 1e-08, %v320_v46  ;;  %v361_v0 = vsub.f32 1.5, %v360_v59  ;;  %v1916_v3 = vpop.eup %1915  ;;  %v462_v16 = vadd.f32 1e-08, %v380_v38  ;;  %v265_v17 = vsub.f32 1.5, %v264_v63 }
 0x19b   :  { %v2344_v61 = vpop.xlane.xlu0 %233  ;;  %1921 = vrcp.f32 %v468_v53  ;;  %v1918_v6 = vpop.eup %1917  ;;  %v299_v52 = vmul.f32 %v1914_v12, %v298_v1  ;;  %v346_v13 = vmul.f32 %v1916_v3, %v2315_v60  ;;  %vm270_vm14 = vcmp.eq.f32.partialorder %v2292_v32, 0.0 }
 0x19c   :  { %1923 = vrcp.f32 %v457_v58  ;;  %v362_v5 = vmul.f32 %v1912_v15, %v361_v0  ;;  %v1920_v14 = vpop.eup %1919  ;;  %v499_v47 = vmul.f32 %v1918_v6, %v2195_v27  ;;  %vm292_vm12 = vcmp.eq.f32.partialorder %v2344_v61, inf }
 0x19d   :  { %1925 = vrsqrt.f32 %v2344_v61  ;;  %v300_v23 = vmul.f32 0.5, %v299_v52  ;;  %v347_v25 = vmul.f32 %v1916_v3, %v346_v13  ;;  %v490_v28 = vmul.f32 %v1920_v14, %v2179_v11 }
 0x19e   :  { %v363_v18 = vmul.f32 %v362_v5, %v2294_v50  ;;  %1927 = vrcp.f32 %v462_v16  ;;  %vm294_vm13 = vcmp.eq.f32.partialorder %v2344_v61, 0.0 }
 0x19f   :  { %v301_v30 = vsub.f32 1.5, %v300_v23  ;;  %v348_v44 = vmul.f32 0.5, %v347_v25 }
 0x1a0   :  { %v365_v8 = vsel %vm364_vm4, %v2294_v50, %v363_v18  ;;  %v266_v50 = vmul.f32 %v2309_v37, %v265_v17  ;;  %v307_v37 = vand.u32 2147483648, %v2320_v4  ;;  %v271_v18 = vand.u32 2147483648, %v2292_v32 }
 0x1a1   :  { %v1922_v54 = vpop.eup %1921  ;;  %v368_v29 = vsel %vm366_vm5, %v367_v19, %v365_v8  ;;  %v302_v45 = vmul.f32 %v1914_v12, %v301_v30  ;;  %v349_v11 = vsub.f32 1.5, %v348_v44  ;;  %v355_v12 = vand.u32 2147483648, %v2315_v60 }
 0x1a2   :  { %v1924_v15 = vpop.eup %1923  ;;  %v500_v39 = vmul.f32 %v1922_v54, %v2213_v42  ;;  %v461_v36 = vadd.f32 1e-08, %v368_v29  ;;  %v267_v9 = vmul.f32 %v266_v50, %v2292_v32  ;;  %v2390_v54 = vpop.xlane.xlu1 %1224 }
 0x1a3   :  { %v2362_v26 = vpop.xlane.xlu0 %231  ;;  %v489_v21 = vmul.f32 %v1924_v15, %v2210_v35  ;;  %v1926_v31 = vpop.eup %1925  ;;  %v344_v35 = vsel %vm342_vm6, %v343_v7, %v341_v48  ;;  %v303_v51 = vmul.f32 %v302_v45, %v2320_v4  ;;  %v350_v53 = vmul.f32 %v1916_v3, %v349_v11 }
 0x1a4   :  { %v1864_v33 = vpack.c.bf16 %v500_v39, %v499_v47  ;;  %v286_v42 = vmul.f32 %v1926_v31, %v2344_v61  ;;  %1929 = vrsqrt.f32 %v2362_v26  ;;  %v1928_v58 = vpop.eup %1927  ;;  %v459_v59 = vadd.f32 1e-08, %v344_v35  ;;  %v2395_v47 = vpop.xlane.xlu2 %1226 }
 0x1a5   :  { %v1839_v27 = vpack.c.bf16 %v490_v28, %v489_v21  ;;  %1931 = vrcp.f32 %v461_v36  ;;  %v305_v46 = vsel %vm304_vm7, %v2320_v4, %v303_v51  ;;  %v351_v62 = vmul.f32 %v350_v53, %v2315_v60  ;;  %v1824_v21 = vld [vmem:[#allocation3 + $0x28] sm:$0xff] }
 0x1a6   :  { %1872 = vst [vmem:[#allocation3 + $0x38] sm:$0xff] %v1864_v33   ;;  %v287_v20 = vmul.f32 %v1926_v31, %v286_v42  ;;  %v308_v38 = vsel %vm306_vm8, %v307_v37, %v305_v46  ;;  %v494_v5 = vmul.f32 %v1928_v58, %v2189_v22  ;;  %1933 = vrcp.f32 %v459_v59 }
 0x1a7   :  { %1867 = vst [vmem:[#allocation3 + $0x18] sm:$0xff] %v1839_v27   ;;  %v353_v1 = vsel %vm352_vm9, %v2315_v60, %v351_v62  ;;  %v269_v48 = vsel %vm268_vm11, %v2292_v32, %v267_v9  ;;  %v456_v17 = vadd.f32 1e-08, %v308_v38  ;;  %v295_v22 = vand.u32 2147483648, %v2344_v61 }
 0x1a8   :  { %v288_v41 = vmul.f32 0.5, %v287_v20  ;;  %v356_v7 = vsel %vm354_vm10, %v355_v12, %v353_v1  ;;  %v272_v15 = vsel %vm270_vm14, %v271_v18, %v269_v48  ;;  %vm280_vm15 = vcmp.eq.f32.partialorder %v2362_v26, inf  ;;  %v1823_v20 = vld [vmem:[#allocation3 + $0x20] sm:$0xff] }
 0x1a9   :  { %v460_v13 = vadd.f32 1e-08, %v356_v7  ;;  %v453_v30 = vadd.f32 1e-08, %v272_v15  ;;  %v283_v33 = vand.u32 2147483648, %v2362_v26  ;;  %vm282_vm0 = vcmp.eq.f32.partialorder %v2362_v26, 0.0 }
 0x1aa   :  { %v1930_v10 = vpop.eup %1929  ;;  %v289_v63 = vsub.f32 1.5, %v288_v41  ;;  %vm1235_vm1 = vcmp.eq.f32.partialorder %v2390_v54, inf  ;;  %vm1247_vm2 = vcmp.eq.f32.partialorder %v2395_v47, inf  ;;  %vm1237_vm3 = vcmp.eq.f32.partialorder %v2390_v54, 0.0 }
 0x1ab   :  { %v1932_v0 = vpop.eup %1931  ;;  %v274_v3 = vmul.f32 %v1930_v10, %v2362_v26  ;;  %1935 = vrcp.f32 %v460_v13  ;;  %v1250_v7 = vand.u32 2147483648, %v2395_v47  ;;  %vm1249_vm4 = vcmp.eq.f32.partialorder %v2395_v47, 0.0 }
 0x1ac   :  { %v493_v6 = vmul.f32 %v1932_v0, %v2227_v49  ;;  %v290_v52 = vmul.f32 %v1926_v31, %v289_v63  ;;  %1937 = vrcp.f32 %v456_v17  ;;  %v1934_v8 = vpop.eup %1933 }
 0x1ad   :  { %v1825_v4 = vld [vmem:[#allocation3 + $0x38] sm:$0xff]  ;;  %v275_v14 = vmul.f32 %v1930_v10, %v274_v3  ;;  %1939 = vrsqrt.f32 %v2390_v54  ;;  %v491_v32 = vmul.f32 %v1934_v8, %v2169_v2 }
 0x1ae   :  { %v1849_v16 = vpack.c.bf16 %v494_v5, %v493_v6  ;;  %v291_v60 = vmul.f32 %v290_v52, %v2344_v61  ;;  %1323 = vmatpush.bf16.xpose.msra.mxu3 %v1825_v4  ;;  %v1820_v6 = vld [vmem:[#allocation3 + $0x18] sm:$0xff] }
 0x1af   :  { %v276_v49 = vmul.f32 0.5, %v275_v14 }
 0x1b0   :  { %1869 = vst [vmem:[#allocation3 + $0x8] sm:$0xff] %v1849_v16   ;;  %v293_v19 = vsel %vm292_vm12, %v2344_v61, %v291_v60 }
 0x1b1   :  { %v296_v23 = vsel %vm294_vm13, %v295_v22, %v293_v19  ;;  %v277_v25 = vsub.f32 1.5, %v276_v49  ;;  %v1936_v29 = vpop.eup %1935 }
 0x1b2   :  { %v455_v39 = vadd.f32 1e-08, %v296_v23  ;;  %v492_v31 = vmul.f32 %v1936_v29, %v2237_v56  ;;  %v1938_v44 = vpop.eup %1937 }
 0x1b3   :  { %v278_v28 = vmul.f32 %v1930_v10, %v277_v25  ;;  %v1940_v42 = vpop.eup %1939  ;;  %v488_v56 = vmul.f32 %v1938_v44, %v2223_v40 }
 0x1b4   :  { %1941 = vrcp.f32 %v455_v39  ;;  %v1844_v27 = vpack.c.bf16 %v492_v31, %v491_v32  ;;  %v1229_v51 = vmul.f32 %v1940_v42, %v2390_v54 }
 0x1b5   :  { %1943 = vrsqrt.f32 %v2395_v47  ;;  %v279_v61 = vmul.f32 %v278_v28, %v2362_v26 }
 0x1b6   :  { %1324 = vmatpush.bf16.xpose.msra.mxu3 %v1824_v21  ;;  %1945 = vrcp.f32 %v453_v30  ;;  %1868 = vst [vmem:[#allocation3 + $0x10] sm:$0xff] %v1844_v27   ;;  %v1230_v41 = vmul.f32 %v1940_v42, %v1229_v51 }
 0x1b7   :  { %v281_v36 = vsel %vm280_vm15, %v2362_v26, %v279_v61 }
 0x1b8   :  { %v284_v45 = vsel %vm282_vm0, %v283_v33, %v281_v36  ;;  %v1231_v40 = vmul.f32 0.5, %v1230_v41 }
 0x1b9   :  { %v454_v50 = vadd.f32 1e-08, %v284_v45 }
 0x1ba   :  { %v1942_v11 = vpop.eup %1941  ;;  %v1232_v12 = vsub.f32 1.5, %v1231_v40 }
 0x1bb   :  { %v1944_v2 = vpop.eup %1943  ;;  %v487_v35 = vmul.f32 %v1942_v11, %v2245_v57  ;;  %1947 = vrcp.f32 %v454_v50  ;;  %v1822_v57 = vld [vmem:[#allocation3 + $0x8] sm:$0xff] }
 0x1bc   :  { %v1241_v26 = vmul.f32 %v1944_v2, %v2395_v47  ;;  %v1946_v46 = vpop.eup %1945  ;;  %v1233_v0 = vmul.f32 %v1940_v42, %v1232_v12 }
 0x1bd   :  { %v1834_v53 = vpack.c.bf16 %v488_v56, %v487_v35  ;;  %v485_v59 = vmul.f32 %v1946_v46, %v2192_v24  ;;  %v1821_v38 = vld [vmem:[#allocation3 + $0x10] sm:$0xff] }
 0x1be   :  { %1325 = vmatpush.bf16.xpose.msra.mxu3 %v1823_v20  ;;  %v1242_v9 = vmul.f32 %v1944_v2, %v1241_v26  ;;  %v1234_v3 = vmul.f32 %v1233_v0, %v2390_v54 }
 0x1bf   :  { %1866 = vst [vmem:[#allocation3] sm:$0xff] %v1834_v53  }
 0x1c0   :  { %v1243_v10 = vmul.f32 0.5, %v1242_v9  ;;  %v1236_v5 = vsel %vm1235_vm1, %v2390_v54, %v1234_v3 }
 0x1c1   :  { %v1948_v58 = vpop.eup %1947 }
 0x1c2   :  { %v486_v37 = vmul.f32 %v1948_v58, %v2251_v43  ;;  %v1244_v63 = vsub.f32 1.5, %v1243_v10  ;;  %v1238_v43 = vand.u32 2147483648, %v2390_v54 }
 0x1c4   :  { %v1829_v62 = vpack.c.bf16 %v486_v37, %v485_v59  ;;  %v1245_v1 = vmul.f32 %v1944_v2, %v1244_v63  ;;  %v1239_v4 = vsel %vm1237_vm3, %v1238_v43, %v1236_v5 }
 0x1c5   :  { %v1252_v14 = vadd.f32 1e-08, %v1239_v4 }
 0x1c6   :  { %1830 = vst [vmem:[#allocation3 + $0x30] sm:$0xff] %v1829_v62   ;;  %1326 = vmatpush.bf16.xpose.msra.mxu3 %v1822_v57  ;;  %v1246_v24 = vmul.f32 %v1245_v1, %v2395_v47  ;;  %v1819_v16 = vld [vmem:[#allocation3] sm:$0xff] }
 0x1c7   :  { %1949 = vrcp.f32 %v1252_v14 }
 0x1c8   :  { %v1248_v52 = vsel %vm1247_vm2, %v2395_v47, %v1246_v24 }
 0x1c9   :  { %v1251_v13 = vsel %vm1249_vm4, %v1250_v7, %v1248_v52 }
 0x1ca   :  { %v1253_v48 = vadd.f32 1e-08, %v1251_v13 }
 0x1cc   :  { %1951 = vrcp.f32 %v1253_v48 }
 0x1cd   :  { %v1950_v17 = vpop.eup %1949  ;;  %v1818_v60 = vld [vmem:[#allocation3 + $0x30] sm:$0xff] }
 0x1ce   :  { %1327 = vmatpush.bf16.xpose.msra.mxu3 %v1821_v38  ;;  %v1256_v49 = vmul.f32 %v1950_v17, %v2233_v55 }
 0x1d2   :  { %v1952_v22 = vpop.eup %1951 }
 0x1d3   :  { %v1257_v18 = vmul.f32 %v1952_v22, %v2206_v34 }
 0x1d5   :  { %v1258_v54 = vpack.c.bf16 %v1257_v18, %v1256_v49 }
 0x1d6   :  { %1328 = vmatpush.bf16.xpose.msra.mxu3 %v1820_v6 }
 0x1de   :  { %1329 = vmatpush.bf16.xpose.msra.mxu3 %v1819_v16 }
 0x1e6   :  { %1330 = vmatpush.bf16.xpose.msra.mxu3 %v1818_v60 }
 0x1ed   :  { %1331 = vmatmul.bf16.vlgmr.msra.gmra.mxu3 %v1258_v54 }
 0x270   :  { %v1332_v19 = vpop.f32.mrf.mxu3 }
 0x271   :  { %1337 = vst [vmem:[#allocation7] sm:$0xff] %v1332_v19 }
 0x278   :  { %v1334_v23 = vpop.f32.mrf.mxu3 }
 0x279   :  { %1338 = vst [vmem:[#allocation7 + $0x8] sm:$0xff] %v1334_v23 }
 0x27a   :  { %1351 = dma.vmem_to_hbm [thread:$0]  %s1344_s8, 256, %s1346_s11, [#allocation6], %s2009_s12, %s2009_s12, %s2010_s4  }
 0x27b   :  { %2003 = dma.done.wait [#allocation6], 256  }
 0x27c   :  { %2004 = vsyncadd [#allocation6], 4294967040 }
 0x27d   :  { %1356 = vsyncpa [#allocation5], 1 }
 0x27e   :  { %1357 = vsyncpa [#allocation6], 1 }

</bundles_post_ra>
